<compile_context>
chip_gen: v6e
topology: v6e:2x2x1
jax: 0.10.0
libtpu: 0.0.40
codegen_flags: <defaults>
</compile_context>

<pallas_src>
import functools

import jax
import jax.numpy as jnp
from jax import lax
from jax.experimental import pallas as pl
from jax.experimental.pallas import tpu as pltpu


# --------------------------------------------------------------------------
# VMEM / tiling helpers
# --------------------------------------------------------------------------
_TILE_CANDIDATES = (1024, 512, 256, 128)


def _vmem_limit_bytes():
    """Generation-aware scoped VMEM limit."""
    try:
        cap = int(pltpu.get_tpu_info().vmem_capacity_bytes)
    except Exception:
        cap = 64 * 1024 * 1024  # be v7x-safe if the query is unavailable
    # ~100 MiB on 128-MiB parts (v5e/v6e), ~50 MiB on 64-MiB parts (v7x).
    return min(100 * 1024 * 1024, int(cap * 0.78))


def _pick_attn_tile_q(B, Lq, Lk, D, Dv, in_bytes, out_bytes, attn_bytes, budget):
    """Largest q tile whose per-step VMEM footprint fits the budget (kernel A)."""
    # K/V blocks are full-Lk; budget conservatively as double-buffered.
    fixed = 2 * Lk * (D + Dv) * in_bytes
    if Lq <= 128:
        cands = [Lq]                       # full dim -> always layout-legal
    else:
        cands = [c for c in _TILE_CANDIDATES if c <= Lq]
    fitting = []
    for tq in cands:
        per = (2 * tq * D * in_bytes            # q (double-buffered)
               + 2 * tq * Dv * out_bytes        # out (double-buffered)
               + 2 * tq * Lk * attn_bytes       # attn out (double-buffered)
               + tq * Lk * (4 + 4 + attn_bytes)  # s, e, attn intermediates
               + tq * (D + Dv) * 4)             # scaled q / f32 out temporaries
        if fixed + per <= budget:
            fitting.append(tq)
    if not fitting:
        return min(cands)                  # still attempt with the smallest tile
    # Megacore balance (v7x: 2 TCs): prefer an even number of parallel steps.
    for tq in fitting:
        if (B * pl.cdiv(Lq, tq)) % 2 == 0:
            return tq
    return fitting[0]


def _pick_flash_tile(length, cap=512):
    if length <= cap:
        return length                      # full dim -> layout-legal
    for t in (512, 256, 128):              # prefer 256-multiples (v6e/v7x MXU)
        if t <= cap and length % t == 0:
            return t
    return cap                             # non-divisible: padded edge block / masked kv tail


def _flash_tiles(Lq, Lk, D, Dv, in_bytes, out_bytes, budget):
    tq = _pick_flash_tile(Lq)
    tk = _pick_flash_tile(Lk)

    def est(tq_, tk_):
        return (2 * tq_ * D * in_bytes + 2 * tk_ * (D + Dv) * in_bytes
                + 2 * tq_ * Dv * out_bytes
                + tq_ * (Dv + 2) * 4            # f32 scratch accumulators
                + tq_ * tk_ * 4 * 3)            # s / p intermediates

    def shrink(t):
        for c in (256, 128):
            if c < t:
                return c
        return t

    while est(tq, tk) > budget:
        if tk > 128 and (tk >= tq or tq <= 128):
            tk = shrink(tk)
        elif tq > 128:
            tq = shrink(tq)
        else:
            break
    return tq, tk


# --------------------------------------------------------------------------
# Kernel A: module-faithful (returns attn).  One (batch, Lq-tile) per step.
# --------------------------------------------------------------------------
def _sdpa_kernel(q_ref, k_ref, v_ref, out_ref, attn_ref, *, inv_temperature,
                 mxu_dtype):
    # Blocks (batch dim squeezed): q (TQ, D), k (Lk, D), v (Lk, Dv)
    # Fold 1/T into q in f32, then cast to the MXU input dtype (bf16 by default
    # -> both matmuls run at the MXU bf16 rate with f32 accumulation).
    q = (q_ref[...].astype(jnp.float32) * inv_temperature).astype(mxu_dtype)
    k = k_ref[...].astype(mxu_dtype)

    # s = q @ k^T on the MXU, contracting last dims directly (no explicit .T).
    s = lax.dot_general(q, k, dimension_numbers=(((1,), (1,)), ((), ())),
                        preferred_element_type=jnp.float32)      # (TQ, Lk)

    # Softmax over the key axis (torch Softmax(dim=2)).
    m = jnp.max(s, axis=-1, keepdims=True)
    e = jnp.exp(s - m)
    denom = jnp.sum(e, axis=-1, keepdims=True)
    # attn is user-visible -> exact reciprocal so rows sum to 1.
    attn = e * pl.reciprocal(denom, approx=False)

    attn_ref[...] = attn.astype(attn_ref.dtype)
    out_ref[...] = jnp.dot(attn.astype(mxu_dtype), v_ref[...].astype(mxu_dtype),
                           preferred_element_type=jnp.float32).astype(out_ref.dtype)


# --------------------------------------------------------------------------
# Kernel B: flash-style (no attn output).  Online softmax across Lk tiles.
# --------------------------------------------------------------------------
def _sdpa_flash_kernel(q_ref, k_ref, v_ref, out_ref,
                       m_sc, l_sc, acc_sc, *, inv_temperature, mxu_dtype,
                       kv_len, block_k):
    kv = pl.program_id(2)

    @pl.when(kv == 0)
    def _():
        m_sc[...] = jnp.full_like(m_sc, -jnp.inf)
        l_sc[...] = jnp.zeros_like(l_sc)
        acc_sc[...] = jnp.zeros_like(acc_sc)

    q = (q_ref[...].astype(jnp.float32) * inv_temperature).astype(mxu_dtype)
    k = k_ref[...].astype(mxu_dtype)                                 # (TK, D)

    s = lax.dot_general(q, k, dimension_numbers=(((1,), (1,)), ((), ())),
                        preferred_element_type=jnp.float32)          # (TQ, TK)

    if kv_len % block_k != 0:
        # kv-tail masking for a block size that does not divide Lk: padded key
        # columns get -inf logits and padded v rows are zeroed (guards against
        # garbage padding producing inf/nan).
        col = kv * block_k + lax.broadcasted_iota(jnp.int32, (1, block_k), 1)
        row = kv * block_k + lax.broadcasted_iota(jnp.int32, (block_k, 1), 0)
        s = jnp.where(col < kv_len, s, -jnp.inf)
        v = jnp.where(row < kv_len, v_ref[...], 0).astype(mxu_dtype)
    else:
        v = v_ref[...].astype(mxu_dtype)                             # (TK, Dv)

    m_prev = m_sc[...]
    m_new = jnp.maximum(m_prev, jnp.max(s, axis=-1, keepdims=True))
    alpha = jnp.exp(m_prev - m_new)
    # TODO(synk): on v6e/v7x a bf16 exp would relieve the EUP for small head dims.
    p = jnp.exp(s - m_new)

    l_sc[...] = alpha * l_sc[...] + jnp.sum(p, axis=-1, keepdims=True)
    acc_sc[...] = alpha * acc_sc[...] + jnp.dot(p.astype(mxu_dtype), v,
                                                preferred_element_type=jnp.float32)
    m_sc[...] = m_new

    @pl.when(kv == pl.num_programs(2) - 1)
    def _():
        # Exact reciprocal: runs once per q tile, so the extra cost is noise.
        out_ref[...] = (acc_sc[...] *
                        pl.reciprocal(l_sc[...], approx=False)).astype(out_ref.dtype)


# --------------------------------------------------------------------------
# Wrapper
# --------------------------------------------------------------------------
def scaled_dot_product_attention(q, k, v, temperature, *, return_attn=True,
                                 mxu_dtype=jnp.bfloat16, attn_dtype=None):
    """q: (B, Lq, D), k: (B, Lk, D), v: (B, Lk, Dv).

    return_attn=True  -> (output (B, Lq, Dv), attn (B, Lq, Lk))   [module-faithful]
    return_attn=False -> output (B, Lq, Dv) only, flash-style (no L^2 buffer).

    mxu_dtype: dtype fed to the MXU (default bf16 with f32 accumulation; pass
               jnp.float32 for bit-faithful module numerics).
    attn_dtype: dtype of the returned attention matrix (default q.dtype; pass
                jnp.bfloat16 to halve the attn HBM write).
    """
    B, Lq, D = q.shape
    _, Lk, _ = k.shape
    Dv = v.shape[-1]

    inv_t = 1.0 / float(temperature)
    mxu_dtype = q.dtype if mxu_dtype is None else jnp.dtype(mxu_dtype)
    attn_dtype = q.dtype if attn_dtype is None else jnp.dtype(attn_dtype)
    out_dtype = q.dtype

    in_bytes = jnp.dtype(q.dtype).itemsize
    out_bytes = jnp.dtype(out_dtype).itemsize
    attn_bytes = jnp.dtype(attn_dtype).itemsize

    vmem_limit = _vmem_limit_bytes()
    budget = vmem_limit - 2 * 1024 * 1024     # headroom for Mosaic scratch

    matmul_flops = 2 * B * Lq * Lk * (D + Dv)
    transcendentals = B * Lq * Lk
    base_bytes = (B * Lq * D * in_bytes + B * Lk * D * in_bytes
                  + B * Lk * Dv * in_bytes + B * Lq * Dv * out_bytes)

    if return_attn:
        tq = _pick_attn_tile_q(B, Lq, Lk, D, Dv, in_bytes, out_bytes, attn_bytes,
                               budget)
        n_q = pl.cdiv(Lq, tq)
        kernel = functools.partial(_sdpa_kernel, inv_temperature=inv_t,
                                   mxu_dtype=mxu_dtype)
        cost = pl.CostEstimate(flops=matmul_flops,
                               transcendentals=transcendentals,
                               bytes_accessed=base_bytes + B * Lq * Lk * attn_bytes)

        def build(kv_pipeline_mode):
            kv_kwargs = ({} if kv_pipeline_mode is None
                         else dict(pipeline_mode=kv_pipeline_mode))
            return pl.pallas_call(
                kernel,
                out_shape=(jax.ShapeDtypeStruct((B, Lq, Dv), out_dtype),
                           jax.ShapeDtypeStruct((B, Lq, Lk), attn_dtype)),
                grid_spec=pltpu.PrefetchScalarGridSpec(
                    num_scalar_prefetch=0,
                    grid=(B, n_q),
                    in_specs=[
                        pl.BlockSpec((None, tq, D), lambda b, i: (b, i, 0)),
                        pl.BlockSpec((None, Lk, D), lambda b, i: (b, 0, 0),
                                     **kv_kwargs),
                        pl.BlockSpec((None, Lk, Dv), lambda b, i: (b, 0, 0),
                                     **kv_kwargs),
                    ],
                    out_specs=[
                        pl.BlockSpec((None, tq, Dv), lambda b, i: (b, i, 0)),
                        pl.BlockSpec((None, tq, Lk), lambda b, i: (b, i, 0)),
                    ],
                ),
                compiler_params=pltpu.CompilerParams(
                    dimension_semantics=("parallel", "parallel"),
                    vmem_limit_bytes=vmem_limit),
                cost_estimate=cost,
            )

        # K/V block index is constant across the inner q-tile axis -> single
        # buffer them (halves their VMEM footprint; matters on 64-MiB v7x).
        # Fall back to default double-buffering if pipeline_mode is unsupported.
        if hasattr(pl, "Buffered"):
            try:
                return build(pl.Buffered(1))(q, k, v)
            except Exception:
                pass
        return build(None)(q, k, v)

    # Flash-style path: tile Lk as the trailing reduction axis; never build attn.
    tq, tk = _flash_tiles(Lq, Lk, D, Dv, in_bytes, out_bytes, budget)
    n_q = pl.cdiv(Lq, tq)
    n_k = pl.cdiv(Lk, tk)
    kernel = functools.partial(_sdpa_flash_kernel, inv_temperature=inv_t,
                               mxu_dtype=mxu_dtype, kv_len=Lk, block_k=tk)
    cost = pl.CostEstimate(flops=matmul_flops,
                           transcendentals=transcendentals,
                           bytes_accessed=base_bytes)
    return pl.pallas_call(
        kernel,
        out_shape=jax.ShapeDtypeStruct((B, Lq, Dv), out_dtype),
        grid_spec=pltpu.PrefetchScalarGridSpec(
            num_scalar_prefetch=0,
            grid=(B, n_q, n_k),
            in_specs=[
                pl.BlockSpec((None, tq, D), lambda b, i, kv: (b, i, 0)),
                pl.BlockSpec((None, tk, D), lambda b, i, kv: (b, kv, 0)),
                pl.BlockSpec((None, tk, Dv), lambda b, i, kv: (b, kv, 0)),
            ],
            out_specs=pl.BlockSpec((None, tq, Dv), lambda b, i, kv: (b, i, 0)),
            scratch_shapes=[
                pltpu.VMEM((tq, 1), jnp.float32),    # running max
                pltpu.VMEM((tq, 1), jnp.float32),    # running sum
                pltpu.VMEM((tq, Dv), jnp.float32),   # output accumulator
            ],
        ),
        compiler_params=pltpu.CompilerParams(
            dimension_semantics=("parallel", "parallel", "arbitrary"),
            vmem_limit_bytes=vmem_limit),
        cost_estimate=cost,
    )(q, k, v)


def _reference(q, k, v, temperature):
    attn = jnp.einsum("bqd,bkd->bqk", q, k) / temperature
    attn = jax.nn.softmax(attn, axis=2)
    out = jnp.einsum("bqk,bkd->bqd", attn, v)
    return out, attn


if __name__ == "__main__":
    root = jax.random.PRNGKey(0)

    def run_case(B, Lq, Lk, D, Dv, key):
        kq, kk, kv_ = jax.random.split(key, 3)
        temperature = float(D) ** 0.5
        q = jax.random.normal(kq, (B, Lq, D), dtype=jnp.float32)
        k = jax.random.normal(kk, (B, Lk, D), dtype=jnp.float32)
        v = jax.random.normal(kv_, (B, Lk, Dv), dtype=jnp.float32)

        out_ref, attn_ref = _reference(q, k, v, temperature)

        # Exact path (f32 MXU inputs): module-faithful numerics.
        out, attn = scaled_dot_product_attention(q, k, v, temperature,
                                                 return_attn=True,
                                                 mxu_dtype=jnp.float32)
        out_f = scaled_dot_product_attention(q, k, v, temperature,
                                             return_attn=False,
                                             mxu_dtype=jnp.float32)
        jax.block_until_ready((out, attn, out_f))
        assert jnp.allclose(out, out_ref, atol=1e-4, rtol=1e-4), "output mismatch"
        assert jnp.allclose(attn, attn_ref, atol=1e-4, rtol=1e-4), "attn mismatch"
        assert jnp.allclose(out_f, out_ref, atol=1e-4, rtol=1e-4), "flash mismatch"

        # Default fast path (bf16 MXU inputs, f32 accumulation).
        out_b, attn_b = scaled_dot_product_attention(q, k, v, temperature,
                                                     return_attn=True)
        out_fb = scaled_dot_product_attention(q, k, v, temperature,
                                              return_attn=False)
        jax.block_until_ready((out_b, attn_b, out_fb))
        assert jnp.allclose(out_b, out_ref, atol=5e-2, rtol=5e-2), "bf16 out mismatch"
        assert jnp.allclose(attn_b, attn_ref, atol=5e-2, rtol=5e-2), "bf16 attn mismatch"
        assert jnp.allclose(out_fb, out_ref, atol=5e-2, rtol=5e-2), "bf16 flash mismatch"

    k1, k2 = jax.random.split(root)
    # Small module-like shapes.
    run_case(B=2, Lq=8, Lk=8, D=32, Dv=32, key=k1)
    # Larger, non-128-divisible shapes: exercises cdiv q tiling and kv-tail masking.
    run_case(B=2, Lq=192, Lk=704, D=64, Dv=64, key=k2)

    print("KERNEL_OK")
</pallas_src>

<mosaic_0001>
module attributes {stable_mosaic.version = 11 : i64} {
  func.func @_sdpa_kernel(%arg0: i32, %arg1: i32, %arg2: memref<1x8x32xf32, #tpu.memory_space<vmem>>, %arg3: memref<1x8x32xf32, #tpu.memory_space<vmem>>, %arg4: memref<1x8x32xf32, #tpu.memory_space<vmem>>, %arg5: memref<1x8x32xf32, #tpu.memory_space<vmem>>, %arg6: memref<1x8x8xf32, #tpu.memory_space<vmem>>) attributes {dimension_semantics = [#tpu.dimension_semantics<parallel>, #tpu.dimension_semantics<parallel>], iteration_bounds = array<i64: 2, 1>, scalar_prefetch = 0 : i64, scratch_operands = 0 : i64, tpu.core_type = #tpu.core_type<tc>, window_params = [{transform_indices = @transform_0, window_bounds = array<i64: 1, 8, 32>}, {pipeline_mode = #tpu.pipeline_mode<synchronous>, transform_indices = @transform_1, window_bounds = array<i64: 1, 8, 32>}, {pipeline_mode = #tpu.pipeline_mode<synchronous>, transform_indices = @transform_2, window_bounds = array<i64: 1, 8, 32>}, {transform_indices = @transform_3, window_bounds = array<i64: 1, 8, 32>}, {transform_indices = @transform_4, window_bounds = array<i64: 1, 8, 8>}]} {
    %c0 = arith.constant 0 : index
    %c0_0 = arith.constant 0 : index
    %c0_1 = arith.constant 0 : index
    %0 = vector.load %arg2[%c0, %c0_0, %c0_1] : memref<1x8x32xf32, #tpu.memory_space<vmem>>, vector<1x8x32xf32>
    %1 = vector.shape_cast %0 : vector<1x8x32xf32> to vector<8x32xf32>
    %cst = arith.constant 0.176776692 : f32
    %2 = vector.broadcast %cst : f32 to vector<8x32xf32>
    %3 = arith.mulf %1, %2 : vector<8x32xf32>
    %c0_2 = arith.constant 0 : index
    %c0_3 = arith.constant 0 : index
    %c0_4 = arith.constant 0 : index
    %4 = vector.load %arg3[%c0_2, %c0_3, %c0_4] : memref<1x8x32xf32, #tpu.memory_space<vmem>>, vector<1x8x32xf32>
    %5 = vector.shape_cast %4 : vector<1x8x32xf32> to vector<8x32xf32>
    %cst_5 = arith.constant dense<0.000000e+00> : vector<8x8xf32>
    %6 = tpu.matmul %3, %5, %cst_5 {dimension_numbers = #tpu.dot_dimension_numbers<[1], [1], [0], [0], [0, 0, 1, 0], [], []>} : vector<8x32xf32>, vector<8x32xf32>, vector<8x8xf32> -> vector<8x8xf32>
    %cst_6 = arith.constant dense<0xFF800000> : vector<8xf32>
    %7 = vector.multi_reduction <maximumf>, %6, %cst_6 [1] : vector<8x8xf32> to vector<8xf32>
    %8 = vector.shape_cast %7 : vector<8xf32> to vector<8x1xf32>
    %9 = vector.broadcast %8 : vector<8x1xf32> to vector<8x8xf32>
    %10 = arith.subf %6, %9 : vector<8x8xf32>
    %11 = math.exp %10 : vector<8x8xf32>
    %cst_7 = arith.constant dense<0.000000e+00> : vector<8xf32>
    %12 = vector.multi_reduction <add>, %11, %cst_7 [1] : vector<8x8xf32> to vector<8xf32>
    %13 = vector.shape_cast %12 : vector<8xf32> to vector<8x1xf32>
    %14 = tpu.reciprocal %13 : vector<8x1xf32> -> vector<8x1xf32>
    %15 = vector.broadcast %14 : vector<8x1xf32> to vector<8x8xf32>
    %16 = arith.mulf %11, %15 : vector<8x8xf32>
    %c0_8 = arith.constant 0 : index
    %c0_9 = arith.constant 0 : index
    %c0_10 = arith.constant 0 : index
    %17 = vector.load %arg6[%c0_8, %c0_9, %c0_10] : memref<1x8x8xf32, #tpu.memory_space<vmem>>, vector<1x8x8xf32>
    %18 = vector.shape_cast %17 : vector<1x8x8xf32> to vector<8x8xf32>
    %19 = vector.shape_cast %16 : vector<8x8xf32> to vector<1x8x8xf32>
    tpu.vector_store %arg6[%c0_8, %c0_9, %c0_10], %19 {strides = array<i32>} : memref<1x8x8xf32, #tpu.memory_space<vmem>>, vector<1x8x8xf32>,
    %c0_11 = arith.constant 0 : index
    %c0_12 = arith.constant 0 : index
    %c0_13 = arith.constant 0 : index
    %20 = vector.load %arg4[%c0_11, %c0_12, %c0_13] : memref<1x8x32xf32, #tpu.memory_space<vmem>>, vector<1x8x32xf32>
    %21 = vector.shape_cast %20 : vector<1x8x32xf32> to vector<8x32xf32>
    %cst_14 = arith.constant dense<0.000000e+00> : vector<8x32xf32>
    %22 = tpu.matmul %16, %21, %cst_14 {dimension_numbers = #tpu.dot_dimension_numbers<[1], [0], [0], [1], [0, 0, 1, 1], [], []>} : vector<8x8xf32>, vector<8x32xf32>, vector<8x32xf32> -> vector<8x32xf32>
    %c0_15 = arith.constant 0 : index
    %c0_16 = arith.constant 0 : index
    %c0_17 = arith.constant 0 : index
    %23 = vector.load %arg5[%c0_15, %c0_16, %c0_17] : memref<1x8x32xf32, #tpu.memory_space<vmem>>, vector<1x8x32xf32>
    %24 = vector.shape_cast %23 : vector<1x8x32xf32> to vector<8x32xf32>
    %25 = vector.shape_cast %22 : vector<8x32xf32> to vector<1x8x32xf32>
    tpu.vector_store %arg5[%c0_15, %c0_16, %c0_17], %25 {strides = array<i32>} : memref<1x8x32xf32, #tpu.memory_space<vmem>>, vector<1x8x32xf32>,
    return
  }
  func.func @transform_0(%arg0: i32, %arg1: i32) -> (i32, i32, i32) {
    %c0_i32 = arith.constant 0 : i32
    %c0_i32_0 = arith.constant 0 : i32
    return %arg0, %arg1, %c0_i32 : i32, i32, i32
  }
  func.func @transform_1(%arg0: i32, %arg1: i32) -> (i32, i32, i32) {
    %c0_i32 = arith.constant 0 : i32
    %c0_i32_0 = arith.constant 0 : i32
    %c0_i32_1 = arith.constant 0 : i32
    return %arg0, %c0_i32, %c0_i32_0 : i32, i32, i32
  }
  func.func @transform_2(%arg0: i32, %arg1: i32) -> (i32, i32, i32) {
    %c0_i32 = arith.constant 0 : i32
    %c0_i32_0 = arith.constant 0 : i32
    %c0_i32_1 = arith.constant 0 : i32
    return %arg0, %c0_i32, %c0_i32_0 : i32, i32, i32
  }
  func.func @transform_3(%arg0: i32, %arg1: i32) -> (i32, i32, i32) {
    %c0_i32 = arith.constant 0 : i32
    %c0_i32_0 = arith.constant 0 : i32
    return %arg0, %arg1, %c0_i32 : i32, i32, i32
  }
  func.func @transform_4(%arg0: i32, %arg1: i32) -> (i32, i32, i32) {
    %c0_i32 = arith.constant 0 : i32
    %c0_i32_0 = arith.constant 0 : i32
    return %arg0, %arg1, %c0_i32 : i32, i32, i32
  }
}

module attributes {stable_mosaic.version = 11 : i64} {
  func.func @_sdpa_kernel(%arg0: i32, %arg1: i32, %arg2: memref<1x8x32xf32, #tpu.memory_space<vmem>>, %arg3: memref<1x8x32xf32, #tpu.memory_space<vmem>>, %arg4: memref<1x8x32xf32, #tpu.memory_space<vmem>>, %arg5: memref<1x8x32xf32, #tpu.memory_space<vmem>>, %arg6: memref<1x8x8xf32, #tpu.memory_space<vmem>>) attributes {dimension_semantics = [#tpu.dimension_semantics<parallel>, #tpu.dimension_semantics<parallel>], iteration_bounds = array<i64: 2, 1>, scalar_prefetch = 0 : i64, scratch_operands = 0 : i64, tpu.core_type = #tpu.core_type<tc>, window_params = [{transform_indices = @transform_0, window_bounds = array<i64: 1, 8, 32>}, {transform_indices = @transform_1, window_bounds = array<i64: 1, 8, 32>}, {transform_indices = @transform_2, window_bounds = array<i64: 1, 8, 32>}, {transform_indices = @transform_3, window_bounds = array<i64: 1, 8, 32>}, {transform_indices = @transform_4, window_bounds = array<i64: 1, 8, 8>}]} {
    %c0 = arith.constant 0 : index
    %c0_0 = arith.constant 0 : index
    %c0_1 = arith.constant 0 : index
    %0 = vector.load %arg2[%c0, %c0_0, %c0_1] : memref<1x8x32xf32, #tpu.memory_space<vmem>>, vector<1x8x32xf32>
    %1 = vector.shape_cast %0 : vector<1x8x32xf32> to vector<8x32xf32>
    %cst = arith.constant 0.176776692 : f32
    %2 = vector.broadcast %cst : f32 to vector<8x32xf32>
    %3 = arith.mulf %1, %2 : vector<8x32xf32>
    %c0_2 = arith.constant 0 : index
    %c0_3 = arith.constant 0 : index
    %c0_4 = arith.constant 0 : index
    %4 = vector.load %arg3[%c0_2, %c0_3, %c0_4] : memref<1x8x32xf32, #tpu.memory_space<vmem>>, vector<1x8x32xf32>
    %5 = vector.shape_cast %4 : vector<1x8x32xf32> to vector<8x32xf32>
    %cst_5 = arith.constant dense<0.000000e+00> : vector<8x8xf32>
    %6 = tpu.matmul %3, %5, %cst_5 {dimension_numbers = #tpu.dot_dimension_numbers<[1], [1], [0], [0], [0, 0, 1, 0], [], []>} : vector<8x32xf32>, vector<8x32xf32>, vector<8x8xf32> -> vector<8x8xf32>
    %cst_6 = arith.constant dense<0xFF800000> : vector<8xf32>
    %7 = vector.multi_reduction <maximumf>, %6, %cst_6 [1] : vector<8x8xf32> to vector<8xf32>
    %8 = vector.shape_cast %7 : vector<8xf32> to vector<8x1xf32>
    %9 = vector.broadcast %8 : vector<8x1xf32> to vector<8x8xf32>
    %10 = arith.subf %6, %9 : vector<8x8xf32>
    %11 = math.exp %10 : vector<8x8xf32>
    %cst_7 = arith.constant dense<0.000000e+00> : vector<8xf32>
    %12 = vector.multi_reduction <add>, %11, %cst_7 [1] : vector<8x8xf32> to vector<8xf32>
    %13 = vector.shape_cast %12 : vector<8xf32> to vector<8x1xf32>
    %14 = tpu.reciprocal %13 : vector<8x1xf32> -> vector<8x1xf32>
    %15 = vector.broadcast %14 : vector<8x1xf32> to vector<8x8xf32>
    %16 = arith.mulf %11, %15 : vector<8x8xf32>
    %c0_8 = arith.constant 0 : index
    %c0_9 = arith.constant 0 : index
    %c0_10 = arith.constant 0 : index
    %17 = vector.load %arg6[%c0_8, %c0_9, %c0_10] : memref<1x8x8xf32, #tpu.memory_space<vmem>>, vector<1x8x8xf32>
    %18 = vector.shape_cast %17 : vector<1x8x8xf32> to vector<8x8xf32>
    %19 = vector.shape_cast %16 : vector<8x8xf32> to vector<1x8x8xf32>
    tpu.vector_store %arg6[%c0_8, %c0_9, %c0_10], %19 {strides = array<i32>} : memref<1x8x8xf32, #tpu.memory_space<vmem>>, vector<1x8x8xf32>,
    %c0_11 = arith.constant 0 : index
    %c0_12 = arith.constant 0 : index
    %c0_13 = arith.constant 0 : index
    %20 = vector.load %arg4[%c0_11, %c0_12, %c0_13] : memref<1x8x32xf32, #tpu.memory_space<vmem>>, vector<1x8x32xf32>
    %21 = vector.shape_cast %20 : vector<1x8x32xf32> to vector<8x32xf32>
    %cst_14 = arith.constant dense<0.000000e+00> : vector<8x32xf32>
    %22 = tpu.matmul %16, %21, %cst_14 {dimension_numbers = #tpu.dot_dimension_numbers<[1], [0], [0], [1], [0, 0, 1, 1], [], []>} : vector<8x8xf32>, vector<8x32xf32>, vector<8x32xf32> -> vector<8x32xf32>
    %c0_15 = arith.constant 0 : index
    %c0_16 = arith.constant 0 : index
    %c0_17 = arith.constant 0 : index
    %23 = vector.load %arg5[%c0_15, %c0_16, %c0_17] : memref<1x8x32xf32, #tpu.memory_space<vmem>>, vector<1x8x32xf32>
    %24 = vector.shape_cast %23 : vector<1x8x32xf32> to vector<8x32xf32>
    %25 = vector.shape_cast %22 : vector<8x32xf32> to vector<1x8x32xf32>
    tpu.vector_store %arg5[%c0_15, %c0_16, %c0_17], %25 {strides = array<i32>} : memref<1x8x32xf32, #tpu.memory_space<vmem>>, vector<1x8x32xf32>,
    return
  }
  func.func @transform_0(%arg0: i32, %arg1: i32) -> (i32, i32, i32) {
    %c0_i32 = arith.constant 0 : i32
    %c0_i32_0 = arith.constant 0 : i32
    return %arg0, %arg1, %c0_i32 : i32, i32, i32
  }
  func.func @transform_1(%arg0: i32, %arg1: i32) -> (i32, i32, i32) {
    %c0_i32 = arith.constant 0 : i32
    %c0_i32_0 = arith.constant 0 : i32
    %c0_i32_1 = arith.constant 0 : i32
    return %arg0, %c0_i32, %c0_i32_0 : i32, i32, i32
  }
  func.func @transform_2(%arg0: i32, %arg1: i32) -> (i32, i32, i32) {
    %c0_i32 = arith.constant 0 : i32
    %c0_i32_0 = arith.constant 0 : i32
    %c0_i32_1 = arith.constant 0 : i32
    return %arg0, %c0_i32, %c0_i32_0 : i32, i32, i32
  }
  func.func @transform_3(%arg0: i32, %arg1: i32) -> (i32, i32, i32) {
    %c0_i32 = arith.constant 0 : i32
    %c0_i32_0 = arith.constant 0 : i32
    return %arg0, %arg1, %c0_i32 : i32, i32, i32
  }
  func.func @transform_4(%arg0: i32, %arg1: i32) -> (i32, i32, i32) {
    %c0_i32 = arith.constant 0 : i32
    %c0_i32_0 = arith.constant 0 : i32
    return %arg0, %arg1, %c0_i32 : i32, i32, i32
  }
}

</mosaic_0001>

<bundles_post_ra>
// kernel: tpu_custom_call.1
= control target key start
LH: loop header
LB: loop body
LE: loop exit
PB: predicated region body
PF: predicated region fallthrough
CT: control target
= control target key end

     0   :  { %10 = vsyncpa [#allocation3], 0  ;;  %s1221_s0 = inlined_call_operand.hbm [shape: f32[2,8,32], index: 0, kind: input, shape index: {}]   ;;  %s1222_s1 = inlined_call_operand.hbm [shape: f32[2,8,32], index: 1, kind: input, shape index: {}]   ;;  %s1223_s2 = inlined_call_operand.hbm [shape: f32[2,8,32], index: 2, kind: input, shape index: {}]   ;;  %s1224_s3 = inlined_call_operand.hbm [shape: f32[2,8,32], index: 3, kind: output, shape index: {0}]   ;;  %s1225_s4 = inlined_call_operand.hbm [shape: f32[2,8,8], index: 4, kind: output, shape index: {1}]  }
   0x1   :  { %12 = vsyncpa [#allocation3 + $0x1], 0 }
   0x2   :  { %13 = vsyncpa [#allocation6], 0 }
   0x3   :  { %14 = vsyncpa [#allocation4], 0 }
   0x4   :  { %16 = vsyncpa [#allocation4 + $0x1], 0 }
   0x5   :  { %17 = vsyncpa [#allocation10], 0 }
   0x6   :  { %19 = vsyncpa [#allocation10 + $0x1], 0  ;;  %s973_s15 = smov 0   ;;  %s975_s16 = smov 0  }
   0x7   :  { %s977_s17 = smov 0   ;;  %s979_s18 = smov 0  }
   0x8   :  { %s981_s19 = smov 0   ;;  %s983_s20 = smov 0  }
   0x9 LB: > { %s620_s21 = sadd.s32 4294967295, %s939_s20   ;;  %s621_s22 = sadd.s32 4294967294, %s939_s20   ;;  %s939_s20 = sphi %s983_s20, %s25_s20   ;;  %s935_s19 = sphi %s981_s19, %s1245_s19   ;;  %s931_s18 = sphi %s979_s18, %s1244_s18   ;;  %s927_s17 = sphi %s977_s17, %s1243_s17   ;;  %s923_s16 = sphi %s975_s16, %s1242_s16   ;;  %s919_s15 = sphi %s973_s15, %s1241_s15  }
   0xa   : > { %p59_p0 = scmp.ne.s32.totalorder %s923_s16, %s919_s15  ;;  %p60_p1 = scmp.eq.s32.totalorder %s620_s21, 0 }
   0xb   : > { %p1005_p2 = scmp.eq.s32.totalorder %s620_s21, 1  ;;  %p143_p3 = scmp.eq.s32.totalorder %s621_s22, 1 }
   0xc   : > { %p1009_p4 = por %p60_p1, %p59_p0  ;;  %p622_p5 = scmp.ge.s32.totalorder %s939_s20, 1 }
   0xd   : > { %s1229_s23 = scalar_select %p1005_p2, 1, 0 }
   0xe   : > { %s1230_s24 = scalar_select %p1009_p4, 1, 0 }
   0xf   : > { %p1014_p6 = por %p143_p3, %p59_p0  ;;  %p178_p7 = scmp.lt.s32.totalorder %s939_s20, 3 }
  0x10   : > { %s1019_s26 = sshll.u32 %s931_s18, 7  ;;  %s941_s5 = smov [#allocation5]  }
  0x11   : > { %s1231_s25 = scalar_select %p1014_p6, 1, 0 }
  0x12   : > { %p1021_p8 = pnand %p622_p5, %p178_p7  ;;  %s1029_s30 = scalar_lea.hbm %s1222_s1, %s1019_s26 }
  0x13   : > { %s193_s6 = sshll.u32 %s941_s5, 4  ;;  %s1038_s9 = scalar_lea.hbm %s1223_s2, %s1019_s26  ;;  %s194_s6 = int_to_ptr.vmem [resolvable:$true] %s193_s6 }
  0x14   : > { %s1232_s27 = scalar_select %p1021_p8, 1, 0 }
  0x15   : > { %p665_p10 = pneg %p1021_p8  ;;  %s942_s11 = smov [#allocation7]  }
  0x16   : > { %s206_s12 = sshll.u32 %s942_s11, 4  ;;  %s741_s13 = scalar_lea.hbm %s1029_s30, 128  ;;  %s1046_s12 = int_to_ptr.vmem [resolvable:$true] %s206_s12 }
  0x17   : > { %p1042_p11 = pnand %p665_p10, %p1009_p4  ;;  %p742_p12 = scmp.ne.s32.totalorder %s1029_s30, %s741_s13 }
  0x18   : > { %s746_s21 = scalar_lea.hbm %s1222_s1, 256  ;;  %p747_p3 = scmp.lt.s32.totalorder %s1029_s30, %s1222_s1 }
  0x19   : > { %p743_p13 = pneg %p1042_p11  ;;  %p748_p5 = scmp.lt.s32.totalorder %s746_s21, %s741_s13 }
  0x1b   : > { %p744_p0 = pnand %p743_p13, %p742_p12  ;;  %p749_p7 = por %p748_p5, %p747_p3 }
  0x1d   : > { %p745_p1 = pneg %p744_p0 }
  0x1f   : > { %p750_p10 = pnand %p749_p7, %p745_p1 }
  0x21   : > { %753 = shalt.err (!%p750_p10)
}
  0x22   : > { %s754_s29 = scalar_lea.vmem %s194_s6, 128  ;;  %p762_p0 = scmp.lt.s32.totalorder %s194_s6, %s194_s6 }
  0x23   : > { %p755_p9 = scmp.ne.s32.totalorder %s194_s6, %s754_s29  ;;  %p763_p4 = scmp.lt.s32.totalorder %s754_s29, %s754_s29 }
  0x25   : > { %p757_p6 = pnand %p755_p9, %p743_p13  ;;  %p764_p8 = por %p763_p4, %p762_p0 }
  0x27   : > { %p758_p12 = pneg %p757_p6 }
  0x29   : > { %p765_p2 = pnand %p764_p8, %p758_p12 }
  0x2b   : > { %768 = shalt.err (!%p765_p2)
}
  0x2c   : > { %668 = dma.hbm_to_vmem [thread:$0]  (!%p1042_p11), %s1029_s30, 128, %s194_s6, [#allocation6]  }
  0x2d   : > { %s769_s5 = scalar_lea.hbm %s1038_s9, 128  ;;  %s774_s11 = scalar_lea.hbm %s1223_s2, 256 }
  0x2e   : > { %p770_p1 = scmp.ne.s32.totalorder %s1038_s9, %s769_s5  ;;  %p775_p2 = scmp.lt.s32.totalorder %s1038_s9, %s1223_s2 }
  0x2f   : > { %p776_p4 = scmp.lt.s32.totalorder %s774_s11, %s769_s5 }
  0x30   : > { %p772_p3 = pnand %p770_p1, %p743_p13 }
  0x31   : > { %p777_p6 = por %p776_p4, %p775_p2 }
  0x32   : > { %p773_p9 = pneg %p772_p3 }
  0x34   : > { %p778_p8 = pnand %p777_p6, %p773_p9 }
  0x36   : > { %781 = shalt.err (!%p778_p8)
}
  0x37   : > { %s782_s30 = scalar_lea.vmem %s1046_s12, 128  ;;  %p790_p12 = scmp.lt.s32.totalorder %s1046_s12, %s1046_s12 }
  0x38   : > { %p783_p5 = scmp.ne.s32.totalorder %s1046_s12, %s782_s30  ;;  %p791_p0 = scmp.lt.s32.totalorder %s782_s30, %s782_s30 }
  0x3a   : > { %p785_p7 = pnand %p783_p5, %p743_p13  ;;  %p792_p1 = por %p791_p0, %p790_p12 }
  0x3c   : > { %p786_p10 = pneg %p785_p7 }
  0x3e   : > { %p793_p3 = pnand %p792_p1, %p786_p10 }
  0x40   : > { %796 = shalt.err (!%p793_p3)
}
  0x41   : > { %671 = dma.hbm_to_vmem [thread:$0]  (!%p1042_p11), %s1038_s9, 128, %s1046_s12, [#allocation6]  }
  0x42   : > { %s37_s6 = sadd.s32 1, %s935_s19  ;;  %s46_s18 = sadd.s32 1, %s927_s17 }
  0x43   : > { %p39_p13 = scmp.ge.s32.totalorder %s37_s6, 2  ;;  %p53_p9 = scmp.ne.s32.totalorder %s927_s17, %s923_s16 }
  0x44   : > { %p54_p2 = scmp.eq.s32.totalorder %s939_s20, 0  ;;  %p683_p4 = scmp.lt.s32.totalorder %s939_s20, 2 }
  0x45   : > { %s1247_s6 = smov (%p39_p13, %s37_s6), 0  ;;  %p1234_p8 = scmp.ne.s32.totalorder %s1229_s23, 0 }
  0x46   : > { %p55_p6 = por %p54_p2, %p53_p9  ;;  %s41_s21 = ssub.s32 %s935_s19, %s1247_s6 }
  0x47   : > { %p1101_p5 = por %p1234_p8, %p53_p9  ;;  %s217_s22 = sand.u32 1, %s927_s17  }
  0x48   : > { %p44_p7 = scmp.eq.s32.totalorder %s41_s21, 0  ;;  %s626_s9 = sshll.u32 %s217_s22, 3 }
  0x49   : > { %s627_s12 = sshll.u32 %s935_s19, 7  ;;  %s221_s8 = scalar_lea.vmem [#allocation2], %s626_s9 }
  0x4a   : > { %s1110_s28 = scalar_select %p44_p7, %s927_s17, %s46_s18  }
  0x4b   : > { %s227_s7 = scalar_lea.hbm %s1221_s0, %s627_s12  ;;  %s229_s11 = sshll.u32 %s221_s8, 4  ;;  %s230_s11 = int_to_ptr.vmem [resolvable:$true] %s229_s11 }
  0x4c   : > { %p1117_p11 = pnand %p683_p4, %p55_p6  ;;  %s218_s13 = scalar_lea.sflag [#allocation3], %s217_s22 }
  0x4d   : > { %s810_s14 = scalar_lea.vmem %s230_s11, 128  ;;  %s943_s30 = smov [#allocation2]  }
  0x4e   : > { %p799_p10 = pneg %p1117_p11  ;;  %p811_p12 = scmp.ne.s32.totalorder %s230_s11, %s810_s14 }
  0x4f   : > { %s815_s18 = sshll.u32 %s943_s30, 4  ;;  %s816_s18 = int_to_ptr.vmem [resolvable:$false] %s815_s18 }
  0x50   : > { %p813_p0 = pnand %p811_p12, %p799_p10  ;;  %s817_s21 = scalar_lea.vmem %s816_s18, 256 }
  0x51   : > { %p818_p3 = scmp.lt.s32.totalorder %s230_s11, %s816_s18  ;;  %p819_p13 = scmp.lt.s32.totalorder %s817_s21, %s810_s14 }
  0x52   : > { %p814_p1 = pneg %p813_p0 }
  0x53   : > { %p820_p9 = por %p819_p13, %p818_p3 }
  0x55   : > { %p821_p2 = pnand %p820_p9, %p814_p1 }
  0x57   : > { %824 = shalt.err (!%p821_p2)
}
  0x58   : > { %675 = dma.hbm_to_vmem [thread:$0]  (!%p1117_p11), %s227_s7, 128, %s230_s11, %s218_s13  }
  0x59   : > { %p1237_p4 = scmp.ne.s32.totalorder %s1232_s27, 0 }
  0x5a   : > { %s1128_s22 = sand.u32 (!%p1237_p4), 1, %s923_s16   ;;  %p1238_p6 = scmp.ne.s32.totalorder (!%p1237_p4), %s1230_s24, 0 }
  0x5b   : > { %238 = sbr.rel (%p1237_p4) target bundleno = 817 (0x331), region = 32  ;;  %s1131_s9 = sshll.u32 (!%p1237_p4), %s1128_s22, 3 }
  0x5c   : > { %s241_s12 = scalar_lea.sflag (!%p1237_p4), [#allocation3], %s1128_s22  ;;  %s244_s29 = scalar_lea.vmem (!%p1237_p4), [#allocation2], %s1131_s9 }
  0x60   : > { %902 = dma.done.wait (%p1238_p6), %s241_s12, 128  }
  0x61   : > { %904 = vsyncadd (%p1238_p6), %s241_s12, 4294967168 }
  0x62   : > { %906 = dma.done.wait (%p1238_p6), [#allocation6], 256  }
  0x63   : > { %908 = vsyncadd (%p1238_p6), [#allocation6], 4294967040  ;;  %v944_v0 = vmov 0.0   ;;  %vm945_vm0 = vmmov 0   ;;  %vm285_vm1 = vcmask 261120   ;;  %v284_v1 = vld [vmem:[#allocation5] sm:$0xff]  ;;  %s482_s8 = scalar_lea.hbm %s1225_s4, %s1019_s26 }
  0x64   : > { %645 = vmatprep.subr.mxu0 %v944_v0  ;;  %647 = vmatprep.mubr.msk.f32.mxu0 %vm945_vm0, %v944_v0  ;;  %v282_v2 = vld [vmem:[%s244_s29] sm:$0xff]  ;;  %vm362_vm2 = vcmask 64512   ;;  %v375_v12 = vld [vmem:[#allocation7] sm:$0xff]  ;;  %s281_s24 = scalar_lea.vmem [#allocation9], %s1131_s9  ;;  %s456_s11 = scalar_lea.sflag [#allocation10], %s1128_s22 }
  0x65   : > { %650 = vmatprep.subr.mxu1 %v944_v0  ;;  %652 = vmatprep.mubr.msk.f32.mxu1 %vm945_vm0, %v944_v0  ;;  %v283_v3 = vmul.f32 0.17677669, %v282_v2  ;;  %s484_s27 = sshll.u32 %s281_s24, 4  ;;  %s946_s13 = smov [#allocation9]   ;;  %s485_s27 = int_to_ptr.vmem [resolvable:$true] %s484_s27 }
  0x66   : > { %646 = vmatpush3.xpose.msk.msra.mxu0 %vm285_vm1, %v284_v1  ;;  %651 = vmatpush3.msra.mxu1 %v375_v12  ;;  %s825_s23 = scalar_lea.vmem %s485_s27, 128  ;;  %s829_s14 = sshll.u32 %s946_s13, 4  ;;  %s830_s14 = int_to_ptr.vmem [resolvable:$false] %s829_s14 }
  0x67   : > { %p826_p8 = scmp.ne.s32.totalorder %s485_s27, %s825_s23  ;;  %s831_s30 = scalar_lea.vmem %s830_s14, 256 }
  0x68   : > { %p832_p10 = scmp.lt.s32.totalorder %s485_s27, %s830_s14  ;;  %p833_p12 = scmp.lt.s32.totalorder %s831_s30, %s825_s23 }
  0x69   : > { %648 = vmatmul.mubr.msk.f32.vlgmr.msra.gmra.mxu0 %vm285_vm1, %v283_v3  ;;  %p827_p7 = pnand %p826_p8, %p1101_p5 }
  0x6a   : > { %p834_p0 = por %p833_p12, %p832_p10 }
  0x6b   : > { %p828_p11 = pneg %p827_p7 }
  0x6d   : > { %p835_p1 = pnand %p834_p0, %p828_p11 }
 0x129   : > { %v358_v4 = vpop.f32.mrf.mxu0 }
 0x12a   : > { %v363_v5 = vsel %vm362_vm2, %v358_v4, -inf }
 0x12b   : > { %364 = vmax.xlane.f32.xlu0 %v363_v5  ;;  %v649_v6 = vpop.f32.mrf.mxu0 }
 0x1b4   : > { %v365_v7 = vpop.xlane.xlu0 %364 }
 0x1b5   : > { %v366_v8 = vsub.f32 %v358_v4, %v365_v7 }
 0x1b7   : > { %v367_v9 = vmul.f32 1.442695, %v366_v8 }
 0x1b9   : > { %737 = vpow2.f32 %v367_v9 }
 0x1c6   : > { %v738_v10 = vpop.eup %737 }
 0x1c7   : > { %v369_v11 = vsel %vm362_vm2, %v738_v10, 0.0 }
 0x1c8   : > { %370 = vadd.xlane.f32.xlu0 %v369_v11 }
 0x251   : > { %v371_v13 = vpop.xlane.xlu0 %370 }
 0x252   : > { %739 = vrcp.f32 %v371_v13 }
 0x25f   : > { %v740_v14 = vpop.eup %739 }
 0x260   : > { %v373_v15 = vmul.f32 %v740_v14, %v738_v10 }
 0x262   : > { %653 = vmatmul.mubr.msk.f32.vlgmr.msra.gmra.mxu1 %vm362_vm2, %v373_v15  ;;  %374 = vst.msk [vmem:[%s281_s24] sm:$0xff] %vm362_vm2, %v373_v15 }
 0x263   : > { %838 = shalt.err (!%p835_p1)
}
 0x264   : > { %s839_s18 = scalar_lea.hbm %s482_s8, 128  ;;  %s843_s29 = scalar_lea.hbm %s1225_s4, 256 }
 0x265   : > { %p840_p3 = scmp.ne.s32.totalorder %s482_s8, %s839_s18  ;;  %p844_p2 = scmp.lt.s32.totalorder %s482_s8, %s1225_s4 }
 0x266   : > { %p845_p4 = scmp.lt.s32.totalorder %s843_s29, %s839_s18 }
 0x267   : > { %p841_p13 = pnand %p840_p3, %p1101_p5 }
 0x268   : > { %p846_p6 = por %p845_p4, %p844_p2 }
 0x269   : > { %p842_p9 = pneg %p841_p13 }
 0x26b   : > { %p847_p8 = pnand %p846_p6, %p842_p9 }
 0x26d   : > { %850 = shalt.err (!%p847_p8)
}
 0x26e   : > { %662 = dma.vmem_to_hbm [thread:$0]  (%p1101_p5), %s485_s27, 128, %s482_s8, %s456_s11  }
 0x26f   : > { %s274_s7 = scalar_lea.vmem [#allocation8], %s1131_s9  ;;  %s1172_s30 = scalar_lea.hbm %s1224_s3, %s1019_s26 }
 0x270   : > { %s470_s23 = sshll.u32 %s274_s7, 4  ;;  %s451_s18 = scalar_lea.sflag [#allocation4], %s1128_s22  ;;  %s1174_s23 = int_to_ptr.vmem [resolvable:$true] %s470_s23 }
 0x271   : > { %s851_s21 = scalar_lea.vmem %s1174_s23, 128  ;;  %s947_s9 = smov [#allocation8]  }
 0x272   : > { %p852_p7 = scmp.ne.s32.totalorder %s1174_s23, %s851_s21  ;;  %s855_s27 = sshll.u32 %s947_s9, 4  ;;  %s856_s27 = int_to_ptr.vmem [resolvable:$false] %s855_s27 }
 0x273   : > { %s857_s26 = scalar_lea.vmem %s856_s27, 256  ;;  %p858_p12 = scmp.lt.s32.totalorder %s1174_s23, %s856_s27 }
 0x274   : > { %p853_p11 = pnand %p852_p7, %p1101_p5  ;;  %p859_p0 = scmp.lt.s32.totalorder %s857_s26, %s851_s21 }
 0x276   : > { %p854_p10 = pneg %p853_p11  ;;  %p860_p1 = por %p859_p0, %p858_p12 }
 0x278   : > { %p861_p3 = pnand %p860_p1, %p854_p10 }
 0x322   : > { %v445_v16 = vpop.f32.mrf.mxu1 }
 0x323   : > { %449 = vst.msk [vmem:[%s274_s7] sm:$0xff] %vm285_vm1, %v445_v16 }
 0x324   : > { %v654_v17 = vpop.f32.mrf.mxu1 }
 0x325   : > { %864 = shalt.err (!%p861_p3)
}
 0x326   : > { %s865_s8 = scalar_lea.hbm %s1172_s30, 128  ;;  %s869_s12 = scalar_lea.hbm %s1224_s3, 256 }
 0x327   : > { %p866_p13 = scmp.ne.s32.totalorder %s1172_s30, %s865_s8  ;;  %p870_p4 = scmp.lt.s32.totalorder %s1172_s30, %s1224_s3 }
 0x328   : > { %p871_p6 = scmp.lt.s32.totalorder %s869_s12, %s865_s8 }
 0x329   : > { %p867_p9 = pnand %p866_p13, %p1101_p5 }
 0x32a   : > { %p872_p8 = por %p871_p6, %p870_p4 }
 0x32b   : > { %p868_p2 = pneg %p867_p9 }
 0x32d   : > { %p873_p7 = pnand %p872_p8, %p868_p2 }
 0x32f   : > { %876 = shalt.err (!%p873_p7)
}
 0x330   : > { %661 = dma.vmem_to_hbm [thread:$0]  (%p1101_p5), %s1174_s23, 128, %s1172_s30, %s451_s18  }
 0x331 PF: > { %s496_s5 = sand.u32 1, %s919_s15   ;;  %p1239_p11 = scmp.ne.s32.totalorder %s1231_s25, 0 }
 0x332   : > { %p1240_p10 = scmp.ge.s32.totalorder %s939_s20, 2  ;;  %s497_s7 = scalar_lea.sflag [#allocation4], %s496_s5 }
 0x334   : > { %p677_p12 = pnand %p1240_p10, %p1239_p11 }
 0x336   : > { %p678_p0 = pneg %p677_p12 }
 0x338   : > { %910 = dma.done.wait (%p678_p0), %s497_s7, 128  }
 0x339   : > { %912 = vsyncadd (%p678_p0), %s497_s7, 4294967168  ;;  %s506_s13 = scalar_lea.sflag [#allocation10], %s496_s5 }
 0x33a   : > { %914 = dma.done.wait (%p678_p0), %s506_s13, 128  }
 0x33b   : > { %916 = vsyncadd (%p678_p0), %s506_s13, 4294967168  ;;  %s25_s20 = sadd.s32 1, %s939_s20   ;;  %s1241_s15 = smov %s923_s16 }
 0x33c   : > { %p22_p1 = scmp.ge.s32.totalorder %s25_s20, 4   ;;  %s1242_s16 = smov %s927_s17 }
 0x33d   : > { %s1243_s17 = smov %s1110_s28  ;;  %s1244_s18 = smov %s935_s19 }
 0x33e   : > { %s1245_s19 = smov %s1247_s6  ;;  %24 = sbr.rel (!%p22_p1) target bundleno = 9 (0x9), region = 104 }
 0x343   :  { %511 = vsyncpa [#allocation3], 1 }
 0x344   :  { %513 = vsyncpa [#allocation3 + $0x1], 1 }
 0x345   :  { %514 = vsyncpa [#allocation6], 1 }
 0x346   :  { %515 = vsyncpa [#allocation4], 1 }
 0x347   :  { %517 = vsyncpa [#allocation4 + $0x1], 1 }
 0x348   :  { %518 = vsyncpa [#allocation10], 1 }
 0x349   :  { %520 = vsyncpa [#allocation10 + $0x1], 1 }

// kernel: tpu_custom_call.1
= control target key start
LH: loop header
LB: loop body
LE: loop exit
PB: predicated region body
PF: predicated region fallthrough
CT: control target
= control target key end

     0   :  { %s1264_s0 = inlined_call_operand.hbm [shape: f32[2,8,32], index: 0, kind: input, shape index: {}]   ;;  %s1265_s1 = inlined_call_operand.hbm [shape: f32[2,8,32], index: 1, kind: input, shape index: {}]   ;;  %s1266_s2 = inlined_call_operand.hbm [shape: f32[2,8,32], index: 2, kind: input, shape index: {}]   ;;  %s1267_s3 = inlined_call_operand.hbm [shape: f32[2,8,32], index: 3, kind: output, shape index: {0}]   ;;  %s1268_s4 = inlined_call_operand.hbm [shape: f32[2,8,8], index: 4, kind: output, shape index: {1}]  }
   0x1   :  { %1272 = sst [smem:[#allocation18_spill]] %s1265_s1 }
   0x2   :  { %10 = vsyncpa [#allocation3], 0 }
   0x3   :  { %12 = vsyncpa [#allocation3 + $0x1], 0 }
   0x4   :  { %13 = vsyncpa [#allocation6], 0 }
   0x5   :  { %15 = vsyncpa [#allocation6 + $0x1], 0 }
   0x6   :  { %16 = vsyncpa [#allocation4], 0 }
   0x7   :  { %18 = vsyncpa [#allocation4 + $0x1], 0 }
   0x8   :  { %19 = vsyncpa [#allocation10], 0 }
   0x9   :  { %21 = vsyncpa [#allocation10 + $0x1], 0  ;;  %s1026_s15 = smov 0   ;;  %s1028_s16 = smov 0  }
   0xa   :  { %s1030_s17 = smov 0   ;;  %s1032_s18 = smov 0  }
   0xb   :  { %s1034_s19 = smov 0   ;;  %s1036_s20 = smov 0  }
   0xc LB: > { %1273 = sst [smem:[#allocation15_spill]] %s988_s19  ;;  %s1057_s21 = sadd.s32 4294967295, %s992_s20   ;;  %s992_s20 = sphi %s1036_s20, %s27_s20   ;;  %s988_s19 = sphi %s1034_s19, %s1287_s19   ;;  %s984_s18 = sphi %s1032_s18, %s1286_s18   ;;  %s980_s17 = sphi %s1030_s17, %s1290_s17   ;;  %s976_s16 = sphi %s1028_s16, %s1289_s16   ;;  %s972_s15 = sphi %s1026_s15, %s1288_s15  }
   0xd   : > { %s673_s22 = sadd.s32 4294967294, %s992_s20   ;;  %s39_s23 = sadd.s32 1, %s988_s19 }
   0xe   : > { %s48_s24 = sadd.s32 1, %s980_s17  ;;  %p41_p0 = scmp.ge.s32.totalorder %s39_s23, 2 }
   0xf   : > { %p55_p1 = scmp.ne.s32.totalorder %s980_s17, %s976_s16  ;;  %p56_p2 = scmp.eq.s32.totalorder %s992_s20, 0 }
  0x10   : > { %p61_p3 = scmp.ne.s32.totalorder %s976_s16, %s972_s15  ;;  %s1292_s23 = smov (%p41_p0, %s39_s23), 0 }
  0x11   : > { %1274 = sst [smem:[#allocation16_spill]] %s1292_s23  ;;  %p1069_p4 = por %p56_p2, %p55_p1 }
  0x12   : > { %p62_p5 = scmp.eq.s32.totalorder %s1057_s21, 0  ;;  %s43_s26 = ssub.s32 %s988_s19, %s1292_s23 }
  0x13   : > { %p139_p6 = scmp.eq.s32.totalorder %s1057_s21, 1  ;;  %p46_p7 = scmp.eq.s32.totalorder %s43_s26, 0 }
  0x14   : > { %p1077_p8 = por %p62_p5, %p61_p3  ;;  %p145_p10 = scmp.eq.s32.totalorder %s673_s22, 1 }
  0x15   : > { %p1081_p9 = por %p139_p6, %p55_p1  ;;  %p738_p13 = scmp.lt.s32.totalorder %s992_s20, 2 }
  0x16   : > { %s1086_s29 = scalar_select %p46_p7, %s980_s17, %s48_s24  }
  0x17   : > { %p1088_p11 = por %p145_p10, %p61_p3  ;;  %s1269_s5 = sand.u32 1, %s980_s17  }
  0x18   : > { %1278 = sst [smem:[#allocation17_spill]] %s1086_s29  ;;  %s1097_s6 = sshll.u32 %s1269_s5, 3 }
  0x19   : > { %s1100_s7 = sshll.u32 %s988_s19, 7  ;;  %p1104_p0 = pnand %p738_p13, %p1069_p4 }
  0x1a   : > { %s212_s9 = sand.u32 1, %s992_s20   ;;  %s1281_s1 = sld [smem:[#allocation18_spill]] }
  0x1b   : > { %s216_s13 = scalar_lea.vmem [#allocation5], %s1097_s6  ;;  %p682_p1 = scmp.ge.s32.totalorder %s992_s20, 1 }
  0x1c   : > { %s223_s14 = sshll.u32 %s216_s13, 4  ;;  %p246_p2 = scmp.lt.s32.totalorder %s992_s20, 3  ;;  %s224_s14 = int_to_ptr.vmem [resolvable:$true] %s223_s14 }
  0x1d   : > { %s1116_s22 = scalar_lea.sflag [#allocation6], %s212_s9  ;;  %p796_p3 = pneg %p1104_p0 }
  0x1e   : > { %s807_s24 = scalar_lea.vmem %s224_s14, 128  ;;  %s994_s25 = smov [#allocation5]  }
  0x1f   : > { %p808_p4 = scmp.ne.s32.totalorder %s224_s14, %s807_s24  ;;  %s812_s26 = sshll.u32 %s994_s25, 4  ;;  %s813_s26 = int_to_ptr.vmem [resolvable:$false] %s812_s26 }
  0x20   : > { %s221_s12 = scalar_lea.hbm %s1281_s1, %s1100_s7  ;;  %s814_s10 = scalar_lea.vmem %s813_s26, 256 }
  0x21   : > { %p810_p5 = pnand %p808_p4, %p796_p3  ;;  %p815_p7 = scmp.lt.s32.totalorder %s224_s14, %s813_s26 }
  0x22   : > { %p816_p10 = scmp.lt.s32.totalorder %s814_s10, %s807_s24 }
  0x23   : > { %p811_p6 = pneg %p810_p5 }
  0x24   : > { %p817_p13 = por %p816_p10, %p815_p7 }
  0x26   : > { %p818_p12 = pnand %p817_p13, %p811_p6 }
  0x28   : > { %821 = shalt.err (!%p818_p12)
}
  0x29   : > { %727 = dma.hbm_to_vmem [thread:$0]  (!%p1104_p0), %s221_s12, 128, %s224_s14, %s1116_s22  }
  0x2a   : > { %p1130_p4 = pnand %p682_p1, %p246_p2  ;;  %s203_s24 = scalar_lea.hbm %s1264_s0, %s1100_s7 }
  0x2b   : > { %s197_s25 = scalar_lea.vmem [#allocation2], %s1097_s6  ;;  %s239_s1 = scalar_lea.hbm %s1266_s2, %s1100_s7 }
  0x2c   : > { %s205_s26 = sshll.u32 %s197_s25, 4  ;;  %s1283_s23 = sand.u32 1, %s980_s17   ;;  %s206_s26 = int_to_ptr.vmem [resolvable:$true] %s205_s26 }
  0x2d   : > { %s194_s19 = scalar_lea.sflag [#allocation3], %s1283_s23  ;;  %s835_s12 = scalar_lea.vmem %s206_s26, 128 }
  0x2e   : > { %p836_p12 = scmp.ne.s32.totalorder %s206_s26, %s835_s12  ;;  %s995_s14 = smov [#allocation2]  }
  0x2f   : > { %s840_s29 = sshll.u32 %s995_s14, 4  ;;  %s841_s29 = int_to_ptr.vmem [resolvable:$false] %s840_s29 }
  0x30   : > { %p838_p1 = pnand %p836_p12, %p796_p3  ;;  %s842_s11 = scalar_lea.vmem %s841_s29, 256 }
  0x31   : > { %p843_p5 = scmp.lt.s32.totalorder %s206_s26, %s841_s29  ;;  %p844_p6 = scmp.lt.s32.totalorder %s842_s11, %s835_s12 }
  0x32   : > { %p839_p2 = pneg %p838_p1 }
  0x33   : > { %p845_p7 = por %p844_p6, %p843_p5 }
  0x35   : > { %p846_p10 = pnand %p845_p7, %p839_p2 }
  0x37   : > { %849 = shalt.err (!%p846_p10)
}
  0x38   : > { %724 = dma.hbm_to_vmem [thread:$0]  (!%p1104_p0), %s203_s24, 128, %s206_s26, %s194_s19  }
  0x39   : > { %s234_s23 = scalar_lea.vmem [#allocation7], %s1097_s6  ;;  %s996_s25 = smov [#allocation7]  }
  0x3a   : > { %s241_s5 = sshll.u32 %s234_s23, 4  ;;  %s868_s29 = sshll.u32 %s996_s25, 4  ;;  %s242_s5 = int_to_ptr.vmem [resolvable:$true] %s241_s5  ;;  %s869_s29 = int_to_ptr.vmem [resolvable:$false] %s868_s29 }
  0x3b   : > { %s863_s13 = scalar_lea.vmem %s242_s5, 128  ;;  %s870_s10 = scalar_lea.vmem %s869_s29, 256 }
  0x3c   : > { %p864_p13 = scmp.ne.s32.totalorder %s242_s5, %s863_s13  ;;  %p871_p2 = scmp.lt.s32.totalorder %s242_s5, %s869_s29 }
  0x3d   : > { %p872_p5 = scmp.lt.s32.totalorder %s870_s10, %s863_s13 }
  0x3e   : > { %p866_p12 = pnand %p864_p13, %p796_p3 }
  0x3f   : > { %p873_p6 = por %p872_p5, %p871_p2 }
  0x40   : > { %p867_p1 = pneg %p866_p12 }
  0x42   : > { %p874_p7 = pnand %p873_p6, %p867_p1 }
  0x44   : > { %877 = shalt.err (!%p874_p7)
}
  0x45   : > { %730 = dma.hbm_to_vmem [thread:$0]  (!%p1104_p0), %s239_s1, 128, %s242_s5, %s1116_s22  }
  0x46   : > { %250 = sbr.rel (%p1130_p4) target bundleno = 797 (0x31d), region = 32  ;;  %s1165_s24 = sand.u32 (!%p1130_p4), 1, %s976_s16  }
  0x47   : > { %s1168_s26 = sshll.u32 (!%p1130_p4), %s1165_s24, 3  ;;  %s253_s8 = scalar_lea.sflag (!%p1130_p4), [#allocation3], %s1165_s24 }
  0x48   : > { %s256_s12 = scalar_lea.vmem (!%p1130_p4), [#allocation2], %s1168_s26 }
  0x4b   : > { %955 = dma.done.wait (%p1077_p8), %s253_s8, 128  }
  0x4c   : > { %957 = vsyncadd (%p1077_p8), %s253_s8, 4294967168  ;;  %s261_s1 = sand.u32 1, %s1057_s21   ;;  %s265_s22 = scalar_lea.vmem [#allocation5], %s1168_s26 }
  0x4d   : > { %s262_s7 = scalar_lea.sflag [#allocation6], %s261_s1 }
  0x4e   : > { %959 = dma.done.wait (%p1077_p8), %s262_s7, 256  }
  0x4f   : > { %961 = vsyncadd (%p1077_p8), %s262_s7, 4294967040  ;;  %v997_v0 = vmov 0.0   ;;  %vm998_vm0 = vmmov 0   ;;  %vm317_vm1 = vcmask 261120   ;;  %v316_v1 = vld [vmem:[%s265_s22] sm:$0xff]  ;;  %v314_v2 = vld [vmem:[%s256_s12] sm:$0xff] }
  0x50   : > { %701 = vmatprep.subr.mxu0 %v997_v0  ;;  %703 = vmatprep.mubr.msk.f32.mxu0 %vm998_vm0, %v997_v0  ;;  %v315_v3 = vmul.f32 0.17677669, %v314_v2  ;;  %vm394_vm2 = vcmask 64512   ;;  %s274_s21 = scalar_lea.vmem [#allocation7], %s1168_s26  ;;  %s313_s27 = scalar_lea.vmem [#allocation9], %s1168_s26 }
  0x51   : > { %706 = vmatprep.subr.mxu1 %v997_v0  ;;  %708 = vmatprep.mubr.msk.f32.mxu1 %vm998_vm0, %v997_v0  ;;  %v407_v12 = vld [vmem:[%s274_s21] sm:$0xff]  ;;  %s693_s9 = sshll.u32 %s984_s18, 7  ;;  %s516_s5 = sshll.u32 %s313_s27, 4  ;;  %s517_s5 = int_to_ptr.vmem [resolvable:$true] %s516_s5 }
  0x52   : > { %702 = vmatpush3.xpose.msk.msra.mxu0 %vm317_vm1, %v316_v1  ;;  %707 = vmatpush3.msra.mxu1 %v407_v12  ;;  %s514_s23 = scalar_lea.hbm %s1268_s4, %s693_s9  ;;  %s488_s13 = scalar_lea.sflag [#allocation10], %s1165_s24 }
  0x53   : > { %s878_s25 = scalar_lea.vmem %s517_s5, 128  ;;  %s999_s29 = smov [#allocation9]  }
  0x54   : > { %p879_p8 = scmp.ne.s32.totalorder %s517_s5, %s878_s25  ;;  %s882_s10 = sshll.u32 %s999_s29, 4  ;;  %s883_s10 = int_to_ptr.vmem [resolvable:$false] %s882_s10 }
  0x55   : > { %704 = vmatmul.mubr.msk.f32.vlgmr.msra.gmra.mxu0 %vm317_vm1, %v315_v3  ;;  %s884_s19 = scalar_lea.vmem %s883_s10, 256  ;;  %p885_p4 = scmp.lt.s32.totalorder %s517_s5, %s883_s10 }
  0x56   : > { %p880_p0 = pnand %p879_p8, %p1081_p9  ;;  %p886_p10 = scmp.lt.s32.totalorder %s884_s19, %s878_s25 }
  0x58   : > { %p881_p3 = pneg %p880_p0  ;;  %p887_p13 = por %p886_p10, %p885_p4 }
  0x5a   : > { %p888_p12 = pnand %p887_p13, %p881_p3 }
 0x115   : > { %v390_v4 = vpop.f32.mrf.mxu0 }
 0x116   : > { %v395_v5 = vsel %vm394_vm2, %v390_v4, -inf }
 0x117   : > { %396 = vmax.xlane.f32.xlu0 %v395_v5  ;;  %v705_v6 = vpop.f32.mrf.mxu0 }
 0x1a0   : > { %v397_v7 = vpop.xlane.xlu0 %396 }
 0x1a1   : > { %v398_v8 = vsub.f32 %v390_v4, %v397_v7 }
 0x1a3   : > { %v399_v9 = vmul.f32 1.442695, %v398_v8 }
 0x1a5   : > { %790 = vpow2.f32 %v399_v9 }
 0x1b2   : > { %v791_v10 = vpop.eup %790 }
 0x1b3   : > { %v401_v11 = vsel %vm394_vm2, %v791_v10, 0.0 }
 0x1b4   : > { %402 = vadd.xlane.f32.xlu0 %v401_v11 }
 0x23d   : > { %v403_v13 = vpop.xlane.xlu0 %402 }
 0x23e   : > { %792 = vrcp.f32 %v403_v13 }
 0x24b   : > { %v793_v14 = vpop.eup %792 }
 0x24c   : > { %v405_v15 = vmul.f32 %v793_v14, %v791_v10 }
 0x24e   : > { %709 = vmatmul.mubr.msk.f32.vlgmr.msra.gmra.mxu1 %vm394_vm2, %v405_v15  ;;  %406 = vst.msk [vmem:[%s313_s27] sm:$0xff] %vm394_vm2, %v405_v15 }
 0x24f   : > { %891 = shalt.err (!%p888_p12)
}
 0x250   : > { %s892_s6 = scalar_lea.hbm %s514_s23, 128  ;;  %s896_s1 = scalar_lea.hbm %s1268_s4, 256 }
 0x251   : > { %p893_p1 = scmp.ne.s32.totalorder %s514_s23, %s892_s6  ;;  %p897_p6 = scmp.lt.s32.totalorder %s514_s23, %s1268_s4 }
 0x252   : > { %p898_p7 = scmp.lt.s32.totalorder %s896_s1, %s892_s6 }
 0x253   : > { %p894_p2 = pnand %p893_p1, %p1081_p9 }
 0x254   : > { %p899_p8 = por %p898_p7, %p897_p6 }
 0x255   : > { %p895_p5 = pneg %p894_p2 }
 0x257   : > { %p900_p0 = pnand %p899_p8, %p895_p5 }
 0x259   : > { %903 = shalt.err (!%p900_p0)
}
 0x25a   : > { %718 = dma.vmem_to_hbm [thread:$0]  (%p1081_p9), %s517_s5, 128, %s514_s23, %s488_s13  }
 0x25b   : > { %s306_s21 = scalar_lea.vmem [#allocation8], %s1168_s26  ;;  %s1215_s25 = scalar_lea.hbm %s1267_s3, %s693_s9 }
 0x25c   : > { %s502_s27 = sshll.u32 %s306_s21, 4  ;;  %s483_s29 = scalar_lea.sflag [#allocation4], %s1165_s24  ;;  %s1217_s27 = int_to_ptr.vmem [resolvable:$true] %s502_s27 }
 0x25d   : > { %s904_s10 = scalar_lea.vmem %s1217_s27, 128  ;;  %s1000_s18 = smov [#allocation8]  }
 0x25e   : > { %p905_p3 = scmp.ne.s32.totalorder %s1217_s27, %s904_s10  ;;  %s908_s26 = sshll.u32 %s1000_s18, 4  ;;  %s909_s26 = int_to_ptr.vmem [resolvable:$false] %s908_s26 }
 0x25f   : > { %s910_s9 = scalar_lea.vmem %s909_s26, 256  ;;  %p911_p13 = scmp.lt.s32.totalorder %s1217_s27, %s909_s26 }
 0x260   : > { %p906_p4 = pnand %p905_p3, %p1081_p9  ;;  %p912_p12 = scmp.lt.s32.totalorder %s910_s9, %s904_s10 }
 0x262   : > { %p907_p10 = pneg %p906_p4  ;;  %p913_p1 = por %p912_p12, %p911_p13 }
 0x264   : > { %p914_p2 = pnand %p913_p1, %p907_p10 }
 0x30e   : > { %v477_v16 = vpop.f32.mrf.mxu1 }
 0x30f   : > { %481 = vst.msk [vmem:[%s306_s21] sm:$0xff] %vm317_vm1, %v477_v16 }
 0x310   : > { %v710_v17 = vpop.f32.mrf.mxu1 }
 0x311   : > { %917 = shalt.err (!%p914_p2)
}
 0x312   : > { %s918_s23 = scalar_lea.hbm %s1215_s25, 128  ;;  %s922_s13 = scalar_lea.hbm %s1267_s3, 256 }
 0x313   : > { %p919_p5 = scmp.ne.s32.totalorder %s1215_s25, %s918_s23  ;;  %p923_p8 = scmp.lt.s32.totalorder %s1215_s25, %s1267_s3 }
 0x314   : > { %p924_p0 = scmp.lt.s32.totalorder %s922_s13, %s918_s23 }
 0x315   : > { %p920_p6 = pnand %p919_p5, %p1081_p9 }
 0x316   : > { %p925_p3 = por %p924_p0, %p923_p8 }
 0x317   : > { %p921_p7 = pneg %p920_p6 }
 0x319   : > { %p926_p4 = pnand %p925_p3, %p921_p7 }
 0x31b   : > { %929 = shalt.err (!%p926_p4)
}
 0x31c   : > { %717 = dma.vmem_to_hbm [thread:$0]  (%p1081_p9), %s1217_s27, 128, %s1215_s25, %s483_s29  }
 0x31d PF: > { %s528_s8 = sand.u32 1, %s972_s15   ;;  %p1284_p10 = scmp.ge.s32.totalorder %s992_s20, 2 }
 0x31e   : > { %s529_s12 = scalar_lea.sflag [#allocation4], %s528_s8 }
 0x31f   : > { %p732_p13 = pnand %p1284_p10, %p1088_p11 }
 0x321   : > { %p733_p12 = pneg %p732_p13 }
 0x323   : > { %963 = dma.done.wait (%p733_p12), %s529_s12, 128  }
 0x324   : > { %965 = vsyncadd (%p733_p12), %s529_s12, 4294967168  ;;  %s538_s1 = scalar_lea.sflag [#allocation10], %s528_s8 }
 0x325   : > { %967 = dma.done.wait (%p733_p12), %s538_s1, 128  }
 0x326   : > { %969 = vsyncadd (%p733_p12), %s538_s1, 4294967168  ;;  %s27_s20 = sadd.s32 1, %s992_s20   ;;  %s1285_s28 = sld [smem:[#allocation17_spill]] }
 0x327   : > { %p24_p1 = scmp.ge.s32.totalorder %s27_s20, 4   ;;  %s1286_s18 = sld [smem:[#allocation15_spill]] }
 0x328   : > { %s1287_s19 = sld [smem:[#allocation16_spill]]  ;;  %s1288_s15 = smov %s976_s16 }
 0x329   : > { %s1289_s16 = smov %s980_s17  ;;  %26 = sbr.rel (!%p24_p1) target bundleno = 12 (0xc), region = 118 }
 0x32c   : > { %s1290_s17 = smov %s1285_s28 }
 0x32e   :  { %543 = vsyncpa [#allocation3], 1 }
 0x32f   :  { %545 = vsyncpa [#allocation3 + $0x1], 1 }
 0x330   :  { %546 = vsyncpa [#allocation6], 1 }
 0x331   :  { %548 = vsyncpa [#allocation6 + $0x1], 1 }
 0x332   :  { %549 = vsyncpa [#allocation4], 1 }
 0x333   :  { %551 = vsyncpa [#allocation4 + $0x1], 1 }
 0x334   :  { %552 = vsyncpa [#allocation10], 1 }
 0x335   :  { %554 = vsyncpa [#allocation10 + $0x1], 1 }

</bundles_post_ra>
